<compile_context>
chip_gen: v6e
topology: v6e:2x2x1
jax: 0.10.0
libtpu: 0.0.40
codegen_flags: <defaults>
</compile_context>

<pallas_src>
import functools

import jax
import jax.numpy as jnp
from jax.experimental import pallas as pl
from jax.experimental.pallas import tpu as pltpu

EPS = 1e-5


# --------------------------------------------------------------------------- kernel 1
def _conv_stats_kernel(xm_ref, prev_ref, nxt_ref, w_ref, mask_ref,
                       y_ref, psum_ref, psq_ref, *, wp2, l_out):
    """Fused upsample+3x3-conv (single MXU matmul) + per-band BN partial stats.

    xm_ref   : (Cin, L)        bf16  -- width-upsampled, width-padded band, rows flat in lanes
    prev_ref : (Cin, Wp2)      bf16  -- original row just above the band (zeros at the top edge)
    nxt_ref  : (Cin, Wp2)      bf16  -- original row just below the band (zeros at the bottom edge)
    w_ref    : (2*C2, 9*Cin)   bf16  -- dy-phase-combined conv taps, rows in [a0,a1,b0,b1] order
    mask_ref : (1, L)          f32   -- 1.0 on real pixels, 0.0 on the 2 width-pad lanes per row
    y_ref    : (2*C2, L)       bf16  -- masked pre-BN conv output (both dy phases, GLU-ordered rows)
    psum/psq : (2*C2, 1)       f32   -- per-band, per-row sum / sum-of-squares over valid pixels
    """
    cin = xm_ref.shape[0]
    # flat zero-padded band: [prev row | th rows | next row | 2 guard lanes]
    guard = jnp.zeros((cin, 2), xm_ref.dtype)
    xflat = jnp.concatenate([prev_ref[...], xm_ref[...], nxt_ref[...], guard], axis=1)

    # K-stacked im2col operand: 9 statically shifted views (3 row offsets x 3 col offsets),
    # stacked along sublanes -> ONE MXU pass, no per-tap f32 accumulator adds.
    pieces = [xflat[:, d * wp2 + k: d * wp2 + k + l_out]
              for d in range(3) for k in range(3)]
    ops = jnp.concatenate(pieces, axis=0)                                  # (9*Cin, L) bf16

    y = jnp.dot(w_ref[...], ops, preferred_element_type=jnp.float32)      # (2*C2, L) f32
    y = y * mask_ref[...]                                                  # zero the pad lanes in place

    psum_ref[...] = jnp.sum(y, axis=1, keepdims=True)
    psq_ref[...] = jnp.sum(y * y, axis=1, keepdims=True)
    y_ref[...] = y.astype(y_ref.dtype)                                     # dense 16-row bf16 store


# --------------------------------------------------------------------------- kernel 2
def _bn_glu_kernel(y_ref, bn_ref, o_ref, *, c_half):
    """Fused BatchNorm affine + GLU.  Rows are pre-arranged as [a(dy0), a(dy1), b(dy0), b(dy1)]."""
    y = y_ref[...].astype(jnp.float32)
    yn = y * bn_ref[0] + bn_ref[1]                    # per-row scale / shift, f32 arithmetic
    a = yn[:c_half]
    b = yn[c_half:]
    o_ref[...] = (a * jax.nn.sigmoid(b)).astype(o_ref.dtype)


# --------------------------------------------------------------------------- glue
def _spectral_normalize(weight_oihw, n_power_iter):
    # TODO(synk): PyTorch's spectral_norm persists the power-iteration vector u as a buffer;
    # here u is re-derived from a fixed key every call (self-consistent with the reference below).
    c2 = weight_oihw.shape[0]
    w2d = weight_oihw.reshape(c2, -1)
    u = jax.random.normal(jax.random.PRNGKey(1), (c2,), jnp.float32)
    u = u / (jnp.linalg.norm(u) + 1e-12)
    for _ in range(n_power_iter):
        v = w2d.T @ u
        v = v / (jnp.linalg.norm(v) + 1e-12)
        u = w2d @ v
        u = u / (jnp.linalg.norm(u) + 1e-12)
    sigma = u @ (w2d @ v)
    return weight_oihw / sigma


def _pick_band_rows(h, wp2, n, cin, max_lanes=2816, min_lanes=192, min_steps=8):
    """Rows of the ORIGINAL image per band: keep th*Wp2 ~2-3k lanes (vreg/VMEM budget), but trade
    band size for extra grid steps when the grid would otherwise be too short to pipeline /
    feed both v7x TensorCores."""
    max_lanes = int(min(max_lanes, (6 << 20) // (18 * max(cin, 1))))   # cap the 9*Cin stacked operand
    divisors = [d for d in range(1, h + 1) if h % d == 0]
    fitting = [d for d in divisors if d * wp2 <= max_lanes] or [1]
    cands = [d for d in fitting if d * wp2 >= min_lanes] or [max(fitting)]
    fat = max(cands)
    if n * (h // fat) >= min_steps:
        return fat            # fat bands already give enough steps (v5e/v6e-friendly)
    return min(cands)         # otherwise maximize steps while staying reasonably lane-dense


# --------------------------------------------------------------------------- wrapper
@functools.partial(jax.jit, static_argnames=("n_power_iter", "rows_per_band"))
def block_g_forward(x_nchw, weight_oihw, gamma, beta, *, n_power_iter=5, rows_per_band=None):
    """x: (N, Cin, H, W) f32.  weight: (2*Cout, Cin, 3, 3).  Returns (N, Cout, 2H, 2W) f32."""
    x_nchw = x_nchw.astype(jnp.float32)
    N, Cin, H, W = x_nchw.shape
    C2 = weight_oihw.shape[0]
    Cout = C2 // 2
    H2, W2 = 2 * H, 2 * W
    Wp2 = W2 + 2                                   # width-padded upsampled row length

    th = _pick_band_rows(H, Wp2, N, Cin) if rows_per_band is None else rows_per_band
    assert H % th == 0, "rows_per_band must divide the input height"
    nb = H // th
    L = th * Wp2                                   # flat lanes per band (2 pad lanes per row)

    # ---- spectral norm + dy-phase-combined conv taps -------------------------------------
    # For output up-row 2p+dy the 3 vertical taps collapse onto ORIGINAL rows {p-1,p} (dy=0)
    # or {p,p+1} (dy=1):  dy=0: w[kh=0] @ row p-1,  (w[kh=1]+w[kh=2]) @ row p
    #                     dy=1: (w[kh=0]+w[kh=1]) @ row p,  w[kh=2] @ row p+1
    w_sn = _spectral_normalize(weight_oihw.astype(jnp.float32), n_power_iter)
    wv = jnp.zeros((2, 3, C2, Cin, 3), jnp.float32)          # [dy, row_off(dr'), o, c, kw]
    wv = wv.at[0, 0].set(w_sn[:, :, 0, :])
    wv = wv.at[0, 1].set(w_sn[:, :, 1, :] + w_sn[:, :, 2, :])
    wv = wv.at[1, 1].set(w_sn[:, :, 0, :] + w_sn[:, :, 1, :])
    wv = wv.at[1, 2].set(w_sn[:, :, 2, :])
    # -> [dy, o, dr', kw, c] -> (2, C2, 9*Cin), matching the kernel's operand stacking order
    w_dy = jnp.transpose(wv, (0, 2, 1, 4, 3)).reshape(2, C2, 9 * Cin)
    # output-row order [a(dy0), a(dy1), b(dy0), b(dy1)] so kernel 2 can split GLU halves at row 8
    w_all = jnp.concatenate([w_dy[0, :Cout], w_dy[1, :Cout],
                             w_dy[0, Cout:], w_dy[1, Cout:]], axis=0).astype(jnp.bfloat16)

    # ---- width-upsampled, width-padded, banded input: ONE fused XLA pass over x ----------
    xb = x_nchw.reshape(N, Cin, nb, th, W).transpose(0, 2, 1, 3, 4).astype(jnp.bfloat16)
    xw = jnp.repeat(xb, 2, axis=4)                                       # nearest, width only
    xw = jnp.pad(xw, ((0, 0), (0, 0), (0, 0), (0, 0), (1, 1)))           # conv zero-pad (width)
    xwf = xw.reshape(N, nb, Cin, L)                                      # rows flat in lanes

    # halo rows (original resolution, zero at the image edges) -- tiny side arrays, no band dup
    zrow = jnp.zeros((N, 1, Cin, Wp2), jnp.bfloat16)
    last_rows = xwf[:, :, :, (th - 1) * Wp2:]
    first_rows = xwf[:, :, :, :Wp2]
    prev_rows = jnp.concatenate([zrow, last_rows[:, :-1]], axis=1)       # (N, nb, Cin, Wp2)
    next_rows = jnp.concatenate([first_rows[:, 1:], zrow], axis=1)

    # mask of real pixels inside one flat band (last 2 lanes of each Wp2-wide row are pad)
    col = jnp.arange(L, dtype=jnp.int32) % Wp2
    valid = (col < W2).astype(jnp.float32).reshape(1, L)

    # ---- VMEM budget derived from the actual chip (v7x has 64 MiB vs 128 MiB on v5e/v6e) --
    try:
        cap = pltpu.get_tpu_info().vmem_capacity_bytes
        vmem_limit = int(min(cap // 2, 64 * 1024 * 1024))
    except Exception:  # pragma: no cover - conservative fallback
        vmem_limit = 32 * 1024 * 1024
    cparams = pltpu.CompilerParams(
        dimension_semantics=("parallel", "parallel"),      # per-band partials only -> megacore OK
        vmem_limit_bytes=vmem_limit)

    # ---- kernel 1: fused upsample-conv (1 MXU matmul / band) + BN partial stats -----------
    # NOTE: w_all / valid use constant index maps (fetched once); single-buffering them via
    # pipeline_mode=pl.Buffered(1) would shave a little VMEM -- skipped, they are ~1-3 KiB.
    y_pre, psum, psq = pl.pallas_call(
        functools.partial(_conv_stats_kernel, wp2=Wp2, l_out=L),
        out_shape=(
            jax.ShapeDtypeStruct((N, nb, 2 * C2, L), jnp.bfloat16),
            jax.ShapeDtypeStruct((N, nb, 2 * C2, 1), jnp.float32),
            jax.ShapeDtypeStruct((N, nb, 2 * C2, 1), jnp.float32),
        ),
        grid_spec=pltpu.PrefetchScalarGridSpec(
            num_scalar_prefetch=0,
            grid=(N, nb),
            in_specs=[
                pl.BlockSpec((None, None, Cin, L), lambda n, b: (n, b, 0, 0)),
                pl.BlockSpec((None, None, Cin, Wp2), lambda n, b: (n, b, 0, 0)),
                pl.BlockSpec((None, None, Cin, Wp2), lambda n, b: (n, b, 0, 0)),
                pl.BlockSpec((2 * C2, 9 * Cin), lambda n, b: (0, 0)),
                pl.BlockSpec((1, L), lambda n, b: (0, 0)),
            ],
            out_specs=(
                pl.BlockSpec((None, None, 2 * C2, L), lambda n, b: (n, b, 0, 0)),
                pl.BlockSpec((None, None, 2 * C2, 1), lambda n, b: (n, b, 0, 0)),
                pl.BlockSpec((None, None, 2 * C2, 1), lambda n, b: (n, b, 0, 0)),
            ),
        ),
        compiler_params=cparams,
    )(xwf, prev_rows, next_rows, w_all, valid)

    # ---- BatchNorm batch stats from the per-band, per-row partials (training mode) --------
    # NOTE: single-pass E[y^2]-E[y]^2 in f32 with a clamp; fine at these magnitudes.
    count = jnp.float32(N * H2 * W2)
    s16 = jnp.sum(psum[..., 0], axis=(0, 1))          # (2*C2,) per stored row
    q16 = jnp.sum(psq[..., 0], axis=(0, 1))
    s = jnp.concatenate([s16[:Cout] + s16[Cout:2 * Cout],          # combine the two dy phases
                         s16[2 * Cout:3 * Cout] + s16[3 * Cout:]])  # -> per-channel (C2,)
    sq = jnp.concatenate([q16[:Cout] + q16[Cout:2 * Cout],
                          q16[2 * Cout:3 * Cout] + q16[3 * Cout:]])
    mean = s / count
    var = jnp.maximum(sq / count - mean * mean, 0.0)
    invstd = jax.lax.rsqrt(var + EPS)
    scale = gamma.astype(jnp.float32) * invstd
    shift = beta.astype(jnp.float32) - mean * scale
    # per-row BN parameters in the kernel's [a0, a1, b0, b1] row order, packed into ONE array
    scale_rows = jnp.concatenate([scale[:Cout], scale[:Cout], scale[Cout:], scale[Cout:]])
    shift_rows = jnp.concatenate([shift[:Cout], shift[:Cout], shift[Cout:], shift[Cout:]])
    bn = jnp.stack([scale_rows, shift_rows]).reshape(2, 2 * C2, 1)

    # ---- kernel 2: fused BN affine + GLU (dense 16-row load, dense 8-row store) ------------
    out_flat = pl.pallas_call(
        functools.partial(_bn_glu_kernel, c_half=2 * Cout),
        out_shape=jax.ShapeDtypeStruct((N, nb, 2 * Cout, L), jnp.float32),
        grid_spec=pltpu.PrefetchScalarGridSpec(
            num_scalar_prefetch=0,
            grid=(N, nb),
            in_specs=[
                pl.BlockSpec((None, None, 2 * C2, L), lambda n, b: (n, b, 0, 0)),
                pl.BlockSpec((2, 2 * C2, 1), lambda n, b: (0, 0, 0)),
            ],
            out_specs=pl.BlockSpec((None, None, 2 * Cout, L), lambda n, b: (n, b, 0, 0)),
        ),
        compiler_params=cparams,
    )(y_pre, bn)

    # ---- drop the 2 width-pad lanes and interleave the two row phases back into NCHW ------
    # TODO(synk): when W2 % 128 == 0 this slice+transpose could be folded into kernel 2 as a
    # direct NCHW store; for W2 < 128 the lane-dense flat layout + one fused XLA pass wins.
    out = out_flat.reshape(N, nb, 2, Cout, th, Wp2)[..., :W2]
    out = jnp.transpose(out, (0, 3, 1, 4, 2, 5)).reshape(N, Cout, H2, W2)
    return out


# --------------------------------------------------------------------------- reference (pure JAX, f32)
def block_g_reference(x_nchw, weight_oihw, gamma, beta, *, n_power_iter=5):
    w_sn = _spectral_normalize(weight_oihw.astype(jnp.float32), n_power_iter)
    x_up = jnp.repeat(jnp.repeat(x_nchw, 2, axis=2), 2, axis=3)
    y = jax.lax.conv_general_dilated(
        x_up, w_sn, window_strides=(1, 1), padding="SAME",
        dimension_numbers=("NCHW", "OIHW", "NCHW"))
    mean = y.mean(axis=(0, 2, 3), keepdims=True)
    var = y.var(axis=(0, 2, 3), keepdims=True)
    yhat = (y - mean) / jnp.sqrt(var + EPS)
    yhat = yhat * gamma.reshape(1, -1, 1, 1) + beta.reshape(1, -1, 1, 1)
    a, b = jnp.split(yhat, 2, axis=1)
    return a * jax.nn.sigmoid(b)


# --------------------------------------------------------------------------- main
if __name__ == "__main__":
    key = jax.random.PRNGKey(0)
    k_x, k_w = jax.random.split(key)

    N, Cin, H, W = 2, 4, 16, 16
    Cout = 4
    C2 = 2 * Cout

    x = jax.random.normal(k_x, (N, Cin, H, W), jnp.float32)
    weight = jax.random.normal(k_w, (C2, Cin, 3, 3), jnp.float32) * 0.1
    gamma = jnp.ones((C2,), jnp.float32)   # fresh BatchNorm2d init
    beta = jnp.zeros((C2,), jnp.float32)

    out = jax.block_until_ready(block_g_forward(x, weight, gamma, beta))
    ref = jax.block_until_ready(block_g_reference(x, weight, gamma, beta))

    assert out.shape == (N, Cout, 2 * H, 2 * W), out.shape
    # bf16 MXU inputs + bf16 pre-BN intermediate vs. a pure-f32 reference -> looser tolerance
    # (accumulation, BN statistics and the BN/GLU arithmetic remain f32 inside the kernels).
    max_err = float(jnp.max(jnp.abs(out - ref)))
    assert jnp.allclose(out, ref, atol=3e-2, rtol=3e-2), max_err

    print("KERNEL_OK")
</pallas_src>

<mosaic_0001>
module attributes {stable_mosaic.version = 11 : i64} {
  func.func @_conv_stats_kernel(%arg0: i32, %arg1: i32, %arg2: memref<1x1x4x272xbf16, #tpu.memory_space<vmem>>, %arg3: memref<1x1x4x34xbf16, #tpu.memory_space<vmem>>, %arg4: memref<1x1x4x34xbf16, #tpu.memory_space<vmem>>, %arg5: memref<16x36xbf16, #tpu.memory_space<vmem>>, %arg6: memref<1x272xf32, #tpu.memory_space<vmem>>, %arg7: memref<1x1x16x272xbf16, #tpu.memory_space<vmem>>, %arg8: memref<1x1x16x1xf32, #tpu.memory_space<vmem>>, %arg9: memref<1x1x16x1xf32, #tpu.memory_space<vmem>>) attributes {dimension_semantics = [#tpu.dimension_semantics<parallel>, #tpu.dimension_semantics<parallel>], iteration_bounds = array<i64: 2, 2>, scalar_prefetch = 0 : i64, scratch_operands = 0 : i64, tpu.core_type = #tpu.core_type<tc>, window_params = [{transform_indices = @transform_0, window_bounds = array<i64: 1, 1, 4, 272>}, {transform_indices = @transform_1, window_bounds = array<i64: 1, 1, 4, 34>}, {transform_indices = @transform_2, window_bounds = array<i64: 1, 1, 4, 34>}, {pipeline_mode = #tpu.pipeline_mode<synchronous>, transform_indices = @transform_3, window_bounds = array<i64: 16, 36>}, {pipeline_mode = #tpu.pipeline_mode<synchronous>, transform_indices = @transform_4, window_bounds = array<i64: 1, 272>}, {transform_indices = @transform_5, window_bounds = array<i64: 1, 1, 16, 272>}, {transform_indices = @transform_6, window_bounds = array<i64: 1, 1, 16, 1>}, {transform_indices = @transform_7, window_bounds = array<i64: 1, 1, 16, 1>}]} {
    %cst = arith.constant 0.000000e+00 : bf16
    %0 = vector.broadcast %cst : bf16 to vector<4x2xbf16>
    %c0 = arith.constant 0 : index
    %c0_0 = arith.constant 0 : index
    %c0_1 = arith.constant 0 : index
    %c0_2 = arith.constant 0 : index
    %1 = vector.load %arg3[%c0, %c0_0, %c0_1, %c0_2] : memref<1x1x4x34xbf16, #tpu.memory_space<vmem>>, vector<1x1x4x34xbf16>
    %2 = vector.shape_cast %1 : vector<1x1x4x34xbf16> to vector<4x34xbf16>
    %c0_3 = arith.constant 0 : index
    %c0_4 = arith.constant 0 : index
    %c0_5 = arith.constant 0 : index
    %c0_6 = arith.constant 0 : index
    %3 = vector.load %arg2[%c0_3, %c0_4, %c0_5, %c0_6] : memref<1x1x4x272xbf16, #tpu.memory_space<vmem>>, vector<1x1x4x272xbf16>
    %4 = vector.shape_cast %3 : vector<1x1x4x272xbf16> to vector<4x272xbf16>
    %c0_7 = arith.constant 0 : index
    %c0_8 = arith.constant 0 : index
    %c0_9 = arith.constant 0 : index
    %c0_10 = arith.constant 0 : index
    %5 = vector.load %arg4[%c0_7, %c0_8, %c0_9, %c0_10] : memref<1x1x4x34xbf16, #tpu.memory_space<vmem>>, vector<1x1x4x34xbf16>
    %6 = vector.shape_cast %5 : vector<1x1x4x34xbf16> to vector<4x34xbf16>
    %7 = tpu.concatenate %2, %4, %6, %0 in 1 : vector<4x34xbf16>, vector<4x272xbf16>, vector<4x34xbf16>, vector<4x2xbf16> -> vector<4x342xbf16>
    %8 = vector.extract_strided_slice %7 {offsets = [0, 0], sizes = [4, 272], strides = [1, 1]} : vector<4x342xbf16> to vector<4x272xbf16>
    %9 = vector.extract_strided_slice %7 {offsets = [0, 1], sizes = [4, 272], strides = [1, 1]} : vector<4x342xbf16> to vector<4x272xbf16>
    %10 = vector.extract_strided_slice %7 {offsets = [0, 2], sizes = [4, 272], strides = [1, 1]} : vector<4x342xbf16> to vector<4x272xbf16>
    %11 = vector.extract_strided_slice %7 {offsets = [0, 34], sizes = [4, 272], strides = [1, 1]} : vector<4x342xbf16> to vector<4x272xbf16>
    %12 = vector.extract_strided_slice %7 {offsets = [0, 35], sizes = [4, 272], strides = [1, 1]} : vector<4x342xbf16> to vector<4x272xbf16>
    %13 = vector.extract_strided_slice %7 {offsets = [0, 36], sizes = [4, 272], strides = [1, 1]} : vector<4x342xbf16> to vector<4x272xbf16>
    %14 = vector.extract_strided_slice %7 {offsets = [0, 68], sizes = [4, 272], strides = [1, 1]} : vector<4x342xbf16> to vector<4x272xbf16>
    %15 = vector.extract_strided_slice %7 {offsets = [0, 69], sizes = [4, 272], strides = [1, 1]} : vector<4x342xbf16> to vector<4x272xbf16>
    %16 = vector.extract_strided_slice %7 {offsets = [0, 70], sizes = [4, 272], strides = [1, 1]} : vector<4x342xbf16> to vector<4x272xbf16>
    %17 = tpu.concatenate %8, %9, %10, %11, %12, %13, %14, %15, %16 in 0 : vector<4x272xbf16>, vector<4x272xbf16>, vector<4x272xbf16>, vector<4x272xbf16>, vector<4x272xbf16>, vector<4x272xbf16>, vector<4x272xbf16>, vector<4x272xbf16>, vector<4x272xbf16> -> vector<36x272xbf16>
    %c0_11 = arith.constant 0 : index
    %c0_12 = arith.constant 0 : index
    %18 = vector.load %arg5[%c0_11, %c0_12] : memref<16x36xbf16, #tpu.memory_space<vmem>>, vector<16x36xbf16>
    %cst_13 = arith.constant dense<0.000000e+00> : vector<16x272xf32>
    %19 = tpu.matmul %18, %17, %cst_13 {dimension_numbers = #tpu.dot_dimension_numbers<[1], [0], [0], [1], [0, 0, 1, 1], [], []>} : vector<16x36xbf16>, vector<36x272xbf16>, vector<16x272xf32> -> vector<16x272xf32>
    %c0_14 = arith.constant 0 : index
    %c0_15 = arith.constant 0 : index
    %20 = vector.load %arg6[%c0_14, %c0_15] : memref<1x272xf32, #tpu.memory_space<vmem>>, vector<1x272xf32>
    %21 = vector.broadcast %20 : vector<1x272xf32> to vector<16x272xf32>
    %22 = arith.mulf %19, %21 : vector<16x272xf32>
    %cst_16 = arith.constant dense<0.000000e+00> : vector<16xf32>
    %23 = vector.multi_reduction <add>, %22, %cst_16 [1] : vector<16x272xf32> to vector<16xf32>
    %24 = vector.shape_cast %23 : vector<16xf32> to vector<16x1xf32>
    %c0_17 = arith.constant 0 : index
    %c0_18 = arith.constant 0 : index
    %c0_19 = arith.constant 0 : index
    %c0_20 = arith.constant 0 : index
    %25 = vector.load %arg8[%c0_17, %c0_18, %c0_19, %c0_20] : memref<1x1x16x1xf32, #tpu.memory_space<vmem>>, vector<1x1x16x1xf32>
    %26 = vector.shape_cast %25 : vector<1x1x16x1xf32> to vector<16x1xf32>
    %27 = vector.shape_cast %24 : vector<16x1xf32> to vector<1x1x16x1xf32>
    tpu.vector_store %arg8[%c0_17, %c0_18, %c0_19, %c0_20], %27 {strides = array<i32>} : memref<1x1x16x1xf32, #tpu.memory_space<vmem>>, vector<1x1x16x1xf32>,
    %28 = arith.mulf %22, %22 : vector<16x272xf32>
    %cst_21 = arith.constant dense<0.000000e+00> : vector<16xf32>
    %29 = vector.multi_reduction <add>, %28, %cst_21 [1] : vector<16x272xf32> to vector<16xf32>
    %30 = vector.shape_cast %29 : vector<16xf32> to vector<16x1xf32>
    %c0_22 = arith.constant 0 : index
    %c0_23 = arith.constant 0 : index
    %c0_24 = arith.constant 0 : index
    %c0_25 = arith.constant 0 : index
    %31 = vector.load %arg9[%c0_22, %c0_23, %c0_24, %c0_25] : memref<1x1x16x1xf32, #tpu.memory_space<vmem>>, vector<1x1x16x1xf32>
    %32 = vector.shape_cast %31 : vector<1x1x16x1xf32> to vector<16x1xf32>
    %33 = vector.shape_cast %30 : vector<16x1xf32> to vector<1x1x16x1xf32>
    tpu.vector_store %arg9[%c0_22, %c0_23, %c0_24, %c0_25], %33 {strides = array<i32>} : memref<1x1x16x1xf32, #tpu.memory_space<vmem>>, vector<1x1x16x1xf32>,
    %34 = arith.truncf %22 : vector<16x272xf32> to vector<16x272xbf16>
    %c0_26 = arith.constant 0 : index
    %c0_27 = arith.constant 0 : index
    %c0_28 = arith.constant 0 : index
    %c0_29 = arith.constant 0 : index
    %35 = vector.load %arg7[%c0_26, %c0_27, %c0_28, %c0_29] : memref<1x1x16x272xbf16, #tpu.memory_space<vmem>>, vector<1x1x16x272xbf16>
    %36 = vector.shape_cast %35 : vector<1x1x16x272xbf16> to vector<16x272xbf16>
    %37 = vector.shape_cast %34 : vector<16x272xbf16> to vector<1x1x16x272xbf16>
    tpu.vector_store %arg7[%c0_26, %c0_27, %c0_28, %c0_29], %37 {strides = array<i32>} : memref<1x1x16x272xbf16, #tpu.memory_space<vmem>>, vector<1x1x16x272xbf16>,
    return
  }
  func.func @transform_0(%arg0: i32, %arg1: i32) -> (i32, i32, i32, i32) {
    %c0_i32 = arith.constant 0 : i32
    %c0_i32_0 = arith.constant 0 : i32
    %c0_i32_1 = arith.constant 0 : i32
    return %arg0, %arg1, %c0_i32, %c0_i32_0 : i32, i32, i32, i32
  }
  func.func @transform_1(%arg0: i32, %arg1: i32) -> (i32, i32, i32, i32) {
    %c0_i32 = arith.constant 0 : i32
    %c0_i32_0 = arith.constant 0 : i32
    %c0_i32_1 = arith.constant 0 : i32
    return %arg0, %arg1, %c0_i32, %c0_i32_0 : i32, i32, i32, i32
  }
  func.func @transform_2(%arg0: i32, %arg1: i32) -> (i32, i32, i32, i32) {
    %c0_i32 = arith.constant 0 : i32
    %c0_i32_0 = arith.constant 0 : i32
    %c0_i32_1 = arith.constant 0 : i32
    return %arg0, %arg1, %c0_i32, %c0_i32_0 : i32, i32, i32, i32
  }
  func.func @transform_3(%arg0: i32, %arg1: i32) -> (i32, i32) {
    %c0_i32 = arith.constant 0 : i32
    %c0_i32_0 = arith.constant 0 : i32
    %c0_i32_1 = arith.constant 0 : i32
    return %c0_i32, %c0_i32_0 : i32, i32
  }
  func.func @transform_4(%arg0: i32, %arg1: i32) -> (i32, i32) {
    %c0_i32 = arith.constant 0 : i32
    %c0_i32_0 = arith.constant 0 : i32
    %c0_i32_1 = arith.constant 0 : i32
    return %c0_i32, %c0_i32_0 : i32, i32
  }
  func.func @transform_5(%arg0: i32, %arg1: i32) -> (i32, i32, i32, i32) {
    %c0_i32 = arith.constant 0 : i32
    %c0_i32_0 = arith.constant 0 : i32
    %c0_i32_1 = arith.constant 0 : i32
    return %arg0, %arg1, %c0_i32, %c0_i32_0 : i32, i32, i32, i32
  }
  func.func @transform_6(%arg0: i32, %arg1: i32) -> (i32, i32, i32, i32) {
    %c0_i32 = arith.constant 0 : i32
    %c0_i32_0 = arith.constant 0 : i32
    %c0_i32_1 = arith.constant 0 : i32
    return %arg0, %arg1, %c0_i32, %c0_i32_0 : i32, i32, i32, i32
  }
  func.func @transform_7(%arg0: i32, %arg1: i32) -> (i32, i32, i32, i32) {
    %c0_i32 = arith.constant 0 : i32
    %c0_i32_0 = arith.constant 0 : i32
    %c0_i32_1 = arith.constant 0 : i32
    return %arg0, %arg1, %c0_i32, %c0_i32_0 : i32, i32, i32, i32
  }
}

module attributes {stable_mosaic.version = 11 : i64} {
  func.func @_bn_glu_kernel(%arg0: i32, %arg1: i32, %arg2: memref<1x1x16x272xbf16, #tpu.memory_space<vmem>>, %arg3: memref<2x16x1xf32, #tpu.memory_space<vmem>>, %arg4: memref<1x1x8x272xf32, #tpu.memory_space<vmem>>) attributes {dimension_semantics = [#tpu.dimension_semantics<parallel>, #tpu.dimension_semantics<parallel>], iteration_bounds = array<i64: 2, 2>, scalar_prefetch = 0 : i64, scratch_operands = 0 : i64, tpu.core_type = #tpu.core_type<tc>, window_params = [{transform_indices = @transform_0, window_bounds = array<i64: 1, 1, 16, 272>}, {pipeline_mode = #tpu.pipeline_mode<synchronous>, transform_indices = @transform_1, window_bounds = array<i64: 2, 16, 1>}, {transform_indices = @transform_2, window_bounds = array<i64: 1, 1, 8, 272>}]} {
    %c0 = arith.constant 0 : index
    %c0_0 = arith.constant 0 : index
    %c0_1 = arith.constant 0 : index
    %c0_2 = arith.constant 0 : index
    %0 = vector.load %arg2[%c0, %c0_0, %c0_1, %c0_2] : memref<1x1x16x272xbf16, #tpu.memory_space<vmem>>, vector<1x1x16x272xbf16>
    %1 = vector.shape_cast %0 : vector<1x1x16x272xbf16> to vector<16x272xbf16>
    %2 = arith.extf %1 : vector<16x272xbf16> to vector<16x272xf32>
    %c0_3 = arith.constant 0 : index
    %c0_4 = arith.constant 0 : index
    %c0_5 = arith.constant 0 : index
    %3 = vector.load %arg3[%c0_3, %c0_4, %c0_5] : memref<2x16x1xf32, #tpu.memory_space<vmem>>, vector<1x16x1xf32>
    %4 = vector.shape_cast %3 : vector<1x16x1xf32> to vector<16x1xf32>
    %5 = vector.broadcast %4 : vector<16x1xf32> to vector<16x272xf32>
    %6 = arith.mulf %2, %5 : vector<16x272xf32>
    %c1 = arith.constant 1 : index
    %c0_6 = arith.constant 0 : index
    %c0_7 = arith.constant 0 : index
    %7 = vector.load %arg3[%c1, %c0_6, %c0_7] : memref<2x16x1xf32, #tpu.memory_space<vmem>>, vector<1x16x1xf32>
    %8 = vector.shape_cast %7 : vector<1x16x1xf32> to vector<16x1xf32>
    %9 = vector.broadcast %8 : vector<16x1xf32> to vector<16x272xf32>
    %10 = arith.addf %6, %9 : vector<16x272xf32>
    %11 = vector.extract_strided_slice %10 {offsets = [0, 0], sizes = [8, 272], strides = [1, 1]} : vector<16x272xf32> to vector<8x272xf32>
    %12 = vector.extract_strided_slice %10 {offsets = [8, 0], sizes = [8, 272], strides = [1, 1]} : vector<16x272xf32> to vector<8x272xf32>
    %13 = arith.negf %12 : vector<8x272xf32>
    %14 = math.exp %13 : vector<8x272xf32>
    %cst = arith.constant 1.000000e+00 : f32
    %15 = vector.broadcast %cst : f32 to vector<8x272xf32>
    %16 = arith.addf %15, %14 : vector<8x272xf32>
    %17 = arith.divf %15, %16 : vector<8x272xf32>
    %18 = arith.mulf %11, %17 : vector<8x272xf32>
    %c0_8 = arith.constant 0 : index
    %c0_9 = arith.constant 0 : index
    %c0_10 = arith.constant 0 : index
    %c0_11 = arith.constant 0 : index
    %19 = vector.load %arg4[%c0_8, %c0_9, %c0_10, %c0_11] : memref<1x1x8x272xf32, #tpu.memory_space<vmem>>, vector<1x1x8x272xf32>
    %20 = vector.shape_cast %19 : vector<1x1x8x272xf32> to vector<8x272xf32>
    %21 = vector.shape_cast %18 : vector<8x272xf32> to vector<1x1x8x272xf32>
    tpu.vector_store %arg4[%c0_8, %c0_9, %c0_10, %c0_11], %21 {strides = array<i32>} : memref<1x1x8x272xf32, #tpu.memory_space<vmem>>, vector<1x1x8x272xf32>,
    return
  }
  func.func @transform_0(%arg0: i32, %arg1: i32) -> (i32, i32, i32, i32) {
    %c0_i32 = arith.constant 0 : i32
    %c0_i32_0 = arith.constant 0 : i32
    %c0_i32_1 = arith.constant 0 : i32
    return %arg0, %arg1, %c0_i32, %c0_i32_0 : i32, i32, i32, i32
  }
  func.func @transform_1(%arg0: i32, %arg1: i32) -> (i32, i32, i32) {
    %c0_i32 = arith.constant 0 : i32
    %c0_i32_0 = arith.constant 0 : i32
    %c0_i32_1 = arith.constant 0 : i32
    %c0_i32_2 = arith.constant 0 : i32
    return %c0_i32, %c0_i32_0, %c0_i32_1 : i32, i32, i32
  }
  func.func @transform_2(%arg0: i32, %arg1: i32) -> (i32, i32, i32, i32) {
    %c0_i32 = arith.constant 0 : i32
    %c0_i32_0 = arith.constant 0 : i32
    %c0_i32_1 = arith.constant 0 : i32
    return %arg0, %arg1, %c0_i32, %c0_i32_0 : i32, i32, i32, i32
  }
}

</mosaic_0001>

<bundles_post_ra>
// kernel: block_g_forward.3
= control target key start
LH: loop header
LB: loop body
LE: loop exit
PB: predicated region body
PF: predicated region fallthrough
CT: control target
= control target key end

     0   :  { %s476_s9 = smov 0   ;;  %s478_s10 = smov 0   ;;  %s551_s0 = inlined_call_operand.vmem [shape: bf16[2,2,16,272], index: 0, kind: input, shape index: {}]   ;;  %s552_s1 = inlined_call_operand.vmem [shape: f32[2,16,1], index: 1, kind: input, shape index: {}]   ;;  %s553_s2 = inlined_call_operand.vmem [shape: f32[2,2,8,272], index: 2, kind: output, shape index: {}]  }
   0x1   :  { %s480_s11 = smov 0   ;;  %s482_s12 = smov 0  }
   0x2   :  { %s484_s13 = smov 0  }
   0x3 LB: > { %s21_s14 = sadd.s32 1, %s450_s11  ;;  %s24_s15 = sadd.s32 1, %s454_s12  ;;  %s458_s13 = sphi %s484_s13, %s12_s13   ;;  %s454_s12 = sphi %s482_s12, %s557_s12   ;;  %s450_s11 = sphi %s480_s11, %s556_s11   ;;  %s446_s10 = sphi %s478_s10, %s555_s10   ;;  %s442_s9 = sphi %s476_s9, %s554_s9  }
   0x4   : > { %p22_p0 = scmp.ge.s32.totalorder %s21_s14, 2  ;;  %p351_p1 = scmp.ge.s32.totalorder %s458_s13, 1 }
   0x5   : > { %p132_p2 = scmp.lt.s32.totalorder %s458_s13, 5 }
   0x6   : > { %s559_s14 = smov (%p22_p0, %s21_s14), 0  ;;  %s561_s15 = smov (!%p22_p0, %s24_s15), %s454_s12 }
   0x7   : > { %p133_p3 = pnand %p351_p1, %p132_p2  ;;  %p26_p4 = scmp.ge.s32.totalorder %s561_s15, 2 }
   0x8   : > { %p162_p5 = scmp.lt.s32.totalorder (!%p133_p3), %s446_s10, 1  ;;  %p164_p6 = scmp.lt.s32.totalorder (!%p133_p3), %s442_s9, 1 }
   0x9   : > { %s563_s15 = smov (%p26_p4, %s561_s15), 0  ;;  %136 = sbr.rel (%p133_p3) target bundleno = 183 (0xb7), region = 28 }
   0xe   : > { %v191_v0 = vld [vmem:[%s552_s1 + $0x8] sm:$0xff]  ;;  %v190_v1 = vld [vmem:[%s552_s1] sm:$0xff]  ;;  %v460_v2 = vmov 0   ;;  %v355_v3 = vld [vmem:[%s552_s1 + $0x18] sm:$0xff]  ;;  %s565_s10 = smov (!%p162_p5, %s446_s10), 1  ;;  %s567_s9 = smov (!%p164_p6, %s442_s9), 1 }
   0xf   : > { %406 = vset.pattern.permute.xlu0 %v460_v2  ;;  %407 = vset.pattern.permute.xlu1 %v460_v2  ;;  %v354_v4 = vld [vmem:[%s552_s1 + $0x10] sm:$0xff]  ;;  %s362_s24 = smul.u32 12, %s565_s10  ;;  %vm250_vm0 = vcmask 130048  }
  0x10   : > { %199 = vperm.xlu0 %406, %v191_v0   ;;  %194 = vperm.xlu1 %407, %v190_v1   ;;  %s361_s25 = smul.u32 6, %s567_s9 }
  0x11   : > { %s363_s3 = smul.u32 3, %s567_s9 }
  0x12   : > { %s168_s26 = sadd.s32 %s362_s24, %s361_s25  ;;  %s364_s4 = smul.u32 6, %s565_s10 }
  0x13   : > { %s352_s27 = sshll.u32 %s168_s26, 2 }
  0x14   : > { %218 = vperm.xlu0 %406, %v355_v3   ;;  %213 = vperm.xlu1 %407, %v354_v4   ;;  %s170_s30 = scalar_lea.vmem %s551_s0, %s352_s27  ;;  %s177_s5 = sadd.s32 %s364_s4, %s363_s3 }
  0x15   : > { %v182_v5 = vld [vmem:[%s170_s30 + $0xc] sm:$0xff]  ;;  %v183_v6 = vld [vmem:[%s170_s30 + $0x8] ss:$12 sps:$4 sm:$0xff]   ;;  %v180_v27 = vld [vmem:[%s170_s30] sm:$0xff]  ;;  %s353_s6 = sshll.u32 %s177_s5, 3 }
  0x16   : > { %v187_v7 = vunpack.c.l.bf16 %v182_v5  ;;  %v188_v8 = vunpack.c.h.bf16 %v182_v5  ;;  %v189_v9 = vunpack.c.h.bf16 %v183_v6  ;;  %v184_v29 = vunpack.c.l.bf16 %v180_v27  ;;  %s179_s16 = scalar_lea.vmem %s553_s2, %s353_s6 }
  0x17   : > { %v185_v30 = vunpack.c.h.bf16 %v180_v27  ;;  %v186_v31 = vunpack.c.l.bf16 %v183_v6 }
  0x8b   : > { %v200_v10 = vpop.permute.xlu0 %199  ;;  %v195_v28 = vpop.permute.xlu1 %194 }
  0x8c   : > { %v205_v11 = vmul.f32 %v200_v10, %v187_v7  ;;  %v206_v12 = vmul.f32 %v200_v10, %v188_v8  ;;  %v207_v13 = vmul.f32 %v200_v10, %v189_v9  ;;  %v202_v32 = vmul.f32 %v195_v28, %v184_v29 }
  0x8d   : > { %v203_v33 = vmul.f32 %v195_v28, %v185_v30  ;;  %v204_v35 = vmul.f32 %v195_v28, %v186_v31 }
  0x8f   : > { %v219_v14 = vpop.permute.xlu0 %218  ;;  %v214_v34 = vpop.permute.xlu1 %213 }
  0x90   : > { %v224_v15 = vadd.f32 %v219_v14, %v205_v11  ;;  %v225_v16 = vadd.f32 %v219_v14, %v206_v12  ;;  %v226_v17 = vadd.f32 %v219_v14, %v207_v13  ;;  %v221_v36 = vadd.f32 %v214_v34, %v202_v32 }
  0x91   : > { %v222_v38 = vadd.f32 %v214_v34, %v203_v33  ;;  %v223_v40 = vadd.f32 %v214_v34, %v204_v35 }
  0x92   : > { %v356_v18 = vmul.f32 -1.442695, %v224_v15  ;;  %v357_v19 = vmul.f32 -1.442695, %v225_v16  ;;  %v358_v20 = vmul.f32 -1.442695, %v226_v17 }
  0x94   : > { %408 = vpow2.f32 %v356_v18 }
  0x95   : > { %410 = vpow2.f32 %v357_v19 }
  0x96   : > { %412 = vpow2.f32 %v358_v20 }
  0xa1   : > { %v409_v21 = vpop.eup %408 }
  0xa2   : > { %v411_v22 = vpop.eup %410  ;;  %v236_v23 = vadd.f32 1.0, %v409_v21 }
  0xa3   : > { %v413_v24 = vpop.eup %412  ;;  %v237_v25 = vadd.f32 1.0, %v411_v22 }
  0xa4   : > { %v238_v26 = vadd.f32 1.0, %v413_v24  ;;  %414 = vrcp.f32 %v236_v23 }
  0xa5   : > { %416 = vrcp.f32 %v237_v25 }
  0xa6   : > { %418 = vrcp.f32 %v238_v26 }
  0xb1   : > { %v415_v37 = vpop.eup %414 }
  0xb2   : > { %v417_v39 = vpop.eup %416  ;;  %v245_v41 = vmul.f32 %v415_v37, %v221_v36 }
  0xb3   : > { %v419_v42 = vpop.eup %418  ;;  %v246_v43 = vmul.f32 %v417_v39, %v222_v38 }
  0xb4   : > { %v247_v44 = vmul.f32 %v419_v42, %v223_v40  ;;  %248 = vst [vmem:[%s179_s16] sm:$0xff] %v245_v41 }
  0xb5   : > { %249 = vst [vmem:[%s179_s16 + $0x8] sm:$0xff] %v246_v43 }
  0xb6   : > { %251 = vst.msk [vmem:[%s179_s16 + $0x10] sm:$0xff] %vm250_vm0, %v247_v44 }
  0xb7 PF: > { %s12_s13 = sadd.s32 1, %s458_s13   ;;  %s554_s9 = smov %s450_s11 }
  0xb8   : > { %p9_p7 = scmp.ge.s32.totalorder %s12_s13, 6   ;;  %s555_s10 = smov %s454_s12 }
  0xb9   : > { %s556_s11 = smov %s559_s14  ;;  %s557_s12 = smov %s563_s15 }
  0xba   :  { %11 = sbr.rel (!%p9_p7) target bundleno = 3 (0x3), region = 59 }

// kernel: block_g_forward.2
= control target key start
LH: loop header
LB: loop body
LE: loop exit
PB: predicated region body
PF: predicated region fallthrough
CT: control target
= control target key end

     0   :  { %s1226_s24 = smov 0   ;;  %s1228_s25 = smov 0   ;;  %s1390_s0 = inlined_call_operand.vmem [shape: bf16[2,2,4,272], index: 0, kind: input, shape index: {}]   ;;  %s1391_s1 = inlined_call_operand.vmem [shape: bf16[2,2,4,34], index: 1, kind: input, shape index: {}]   ;;  %s1392_s2 = inlined_call_operand.vmem [shape: bf16[2,2,4,34], index: 2, kind: input, shape index: {}]   ;;  %s1393_s3 = inlined_call_operand.vmem [shape: bf16[16,36], index: 3, kind: input, shape index: {}]   ;;  %s1394_s4 = inlined_call_operand.vmem [shape: f32[1,272], index: 4, kind: input, shape index: {}]   ;;  %s1395_s5 = inlined_call_operand.vmem [shape: bf16[2,2,16,272], index: 5, kind: output, shape index: {0}]   ;;  %s1396_s6 = inlined_call_operand.vmem [shape: f32[2,2,16,1], index: 6, kind: output, shape index: {1}]   ;;  %s1397_s7 = inlined_call_operand.vmem [shape: f32[2,2,16,1], index: 7, kind: output, shape index: {2}]  }
   0x1   :  { %s1230_s26 = smov 0   ;;  %s1232_s27 = smov 0  }
   0x2   :  { %s1234_s28 = smov 0  }
   0x3 LB: > { %s27_s29 = sadd.s32 1, %s1162_s26  ;;  %s30_s30 = sadd.s32 1, %s1166_s27  ;;  %s1170_s28 = sphi %s1234_s28, %s18_s28   ;;  %s1166_s27 = sphi %s1232_s27, %s1401_s27   ;;  %s1162_s26 = sphi %s1230_s26, %s1400_s26   ;;  %s1158_s25 = sphi %s1228_s25, %s1399_s25   ;;  %s1154_s24 = sphi %s1226_s24, %s1398_s24  }
   0x4   : > { %p28_p0 = scmp.ge.s32.totalorder %s27_s29, 2  ;;  %p1030_p1 = scmp.ge.s32.totalorder %s1170_s28, 1 }
   0x5   : > { %p296_p2 = scmp.lt.s32.totalorder %s1170_s28, 5 }
   0x6   : > { %s1403_s29 = smov (%p28_p0, %s27_s29), 0  ;;  %s1405_s30 = smov (!%p28_p0, %s30_s30), %s1166_s27 }
   0x7   : > { %p297_p3 = pnand %p1030_p1, %p296_p2  ;;  %p32_p4 = scmp.ge.s32.totalorder %s1405_s30, 2 }
   0x8   : > { %p370_p5 = scmp.lt.s32.totalorder (!%p297_p3), %s1158_s25, 1  ;;  %p372_p6 = scmp.lt.s32.totalorder (!%p297_p3), %s1154_s24, 1 }
   0x9   : > { %s1407_s30 = smov (%p32_p4, %s1405_s30), 0  ;;  %300 = sbr.rel (%p297_p3) target bundleno = 654 (0x28e), region = 40 }
   0xa   : > { %s1173_s17 = smov (!%p297_p3), 50   ;;  %s1174_s22 = smov (!%p297_p3), 34  }
   0xb   : > { %s1179_s13 = smov (!%p297_p3), 59   ;;  %s1180_s14 = smov (!%p297_p3), 60  }
   0xe   : > { %v431_v0 = vlaneseq  ;;  %v1172_v1 = vmov 1983009808   ;;  %s1409_s25 = smov (!%p370_p5, %s1158_s25), 1  ;;  %s1411_s24 = smov (!%p372_p6, %s1154_s24), 1  ;;  %vm449_vm0 = vcmask 277504   ;;  %v1177_v19 = vmov 0.0  }
   0xf   : > { %v429_v2 = vunpack.c.l.s4 %v1172_v1  ;;  %s1032_s8 = sshll.u32 %s1409_s25, 1  ;;  %s1073_s9 = smul.u32 6, %s1409_s25  ;;  %1062 = vmatprep.subr.bf16.mxu1 %v1177_v19  ;;  %vm466_vm1 = vcmask 408576   ;;  %vm470_vm2 = vcmask 687104   ;;  %vm1184_vm3 = vmmov 0  }
  0x10   : > { %v1262_v4 = vshrl.u32 %v431_v0, 7  ;;  %s384_s10 = sadd.s32 %s1032_s8, %s1411_s24  ;;  %s1072_s11 = smul.u32 3, %s1411_s24  ;;  %1068 = vmatprep.mubr.msk.bf16.mxu1 %vm1184_vm3, %v1177_v19  ;;  %v1185_v32 = vmov 0   ;;  %vm553_vm4 = vcmask 474112   ;;  %vm556_vm5 = vcmask 1041408  }
  0x11   : > { %v430_v3 = vunpack.c.0.s8 %v429_v2  ;;  %s1033_s12 = sshll.u32 %s384_s10, 1  ;;  %s1175_s10 = smov 93   ;;  %657 = vmatprep.mubr.bf16.mxu0 %v1185_v32  ;;  %vm526_vm6 = vcmask 752640   ;;  %vm535_vm7 = vcmask 490496   ;;  %vm517_vm8 = vcmask 760832  }
  0x12   : > { %s394_s15 = scalar_lea.vmem %s1392_s2, %s1033_s12  ;;  %s376_s16 = sadd.s32 %s1073_s9, %s1072_s11  ;;  %vm544_vm9 = vcmask 482304   ;;  %vm564_vm10 = vcmask 1043456   ;;  %vm484_vm11 = vcmask 1039360   ;;  %vm571_vm12 = vcmask 1045504   ;;  %v709_v32 = vld [vmem:[%s1394_s4] sm:$0x7] }
  0x13   : > { %v1043_v5 = vld.sshfl [vmem:[%s394_s15] sm:$0x3 pattern:$0x76325410]  ;;  %v433_v6 = vsub.s32 %v430_v3, %v1262_v4  ;;  %s1031_s18 = sshll.u32 %s376_s16, 1  ;;  %s386_s9 = scalar_lea.vmem %s1391_s1, %s1033_s12  ;;  %vm496_vm13 = vcmask 1031168  }
  0x14   : > { %460 = vrot.lane.b32.xlu1 %v1043_v5, %s1173_s17  ;;  %s378_s21 = scalar_lea.vmem %s1390_s0, %s1031_s18  ;;  %v423_v13 = vld [vmem:[%s386_s9] sm:$0x3]  ;;  %s1176_s11 = smov 58   ;;  %vm508_vm14 = vcmask 769024   ;;  %vm612_vm15 = vcmask 293888  }
  0x15   : > { %v424_v7 = vld [vmem:[%s378_s21] sm:$0x3f]  ;;  %s1178_s12 = smov 92   ;;  %s1181_s15 = smov 126  }
  0x16   : > { %v434_v8 = vrot.slane %v424_v7, %v433_v6  ;;  %v427_v9 = vcombine.high %v424_v7, %v424_v7  ;;  %s1182_s16 = smov 127   ;;  %s1183_s17 = smov 94  }
  0x17   : > { %s1074_s20 = smul.u32 6, %s1411_s24 }
  0x18   : > { %443 = vrot.lane.b32.xlu1 %v434_v8, %s1174_s22  ;;  %v442_v10 = vcombine.high %v434_v8, %v434_v8  ;;  %v441_v11 = vrot.slane %v427_v9, %v433_v6  ;;  %s1075_s21 = smul.u32 12, %s1409_s25 }
  0x1a   : > { %445 = vrot.lane.b32.xlu0 %v442_v10, %s1174_s22 }
  0x1e   : > { %447 = vrot.lane.b32.xlu0 %v441_v11, %s1174_s22  ;;  %s401_s22 = sadd.s32 %s1075_s21, %s1074_s20 }
  0x1f   : > { %s1036_s9 = sshll.u32 %s401_s22, 2 }
  0x86   : > { %v461_v12 = vpop.permute.xlu1 %460 }
  0x8a   : > { %v444_v14 = vpop.permute.xlu1 %443 }
  0x8b   : > { %v1277_v15 = vsel %vm449_vm0, %v423_v13, %v444_v14 }
  0x8c   : > { %v446_v16 = vpop.permute.xlu0 %445  ;;  %511 = vrot.lane.b32.xlu1 %v1277_v15, %s1175_s10  ;;  %547 = vrot.lane.b32.xlu0 %v1277_v15, %s1176_s11  ;;  %v475_v17 = vrot.slane %v1277_v15, 6  ;;  %v499_v21 = vrot.slane %v1277_v15, 2  ;;  %v487_v23 = vrot.slane %v1277_v15, 4 }
  0x8d   : > { %v1284_v18 = vsel %vm449_vm0, %v444_v14, %v446_v16 }
  0x8e   : > { %v476_v26 = vrot.slane %v1284_v18, 6  ;;  %v488_v27 = vrot.slane %v1284_v18, 4  ;;  %v500_v28 = vrot.slane %v1284_v18, 2 }
  0x90   : > { %549 = vrot.lane.b32.xlu1 %v1284_v18, %s1176_s11  ;;  %520 = vrot.lane.b32.xlu0 %v475_v17, %s1178_s12  ;;  %v448_v20 = vpop.permute.xlu0 %447 }
  0x91   : > { %v451_v22 = vsel %vm449_vm0, %v446_v16, %v448_v20  ;;  %vm785_vm0 = vcmask 125952  }
  0x92   : > { %v469_v24 = vsel %vm466_vm1, %v451_v22, %v461_v12  ;;  %vm733_vm1 = vcmask 130048  }
  0x93   : > { %v1295_v25 = vsel %vm470_vm2, %v469_v24, 0  ;;  %vm743_vm2 = vcmask 7168  }
  0x94   : > { %513 = vrot.lane.b32.xlu1 %v1284_v18, %s1175_s10  ;;  %538 = vrot.lane.b32.xlu0 %v499_v21, %s1179_s13  ;;  %v477_v29 = vrot.slane %v1295_v25, 6  ;;  %v501_v30 = vrot.slane %v1295_v25, 2  ;;  %v489_v31 = vrot.slane %v1295_v25, 4 }
  0x98   : > { %529 = vrot.lane.b32.xlu1 %v487_v23, %s1180_s14  ;;  %490 = vrot.lane.b32.xlu0 %v487_v23, %s1181_s15 }
  0x9c   : > { %478 = vrot.lane.b32.xlu1 %v475_v17, %s1182_s16  ;;  %551 = vrot.lane.b32.xlu0 %v1295_v25, %s1176_s11 }
  0xa0   : > { %522 = vrot.lane.b32.xlu1 %v476_v26, %s1178_s12  ;;  %515 = vrot.lane.b32.xlu0 %v1295_v25, %s1175_s10 }
  0xa4   : > { %531 = vrot.lane.b32.xlu1 %v488_v27, %s1180_s14  ;;  %540 = vrot.lane.b32.xlu0 %v500_v28, %s1179_s13 }
  0xa8   : > { %480 = vrot.lane.b32.xlu1 %v476_v26, %s1182_s16  ;;  %492 = vrot.lane.b32.xlu0 %v488_v27, %s1181_s15 }
  0xac   : > { %504 = vrot.lane.b32.xlu1 %v500_v28, %s1183_s17  ;;  %524 = vrot.lane.b32.xlu0 %v477_v29, %s1178_s12  ;;  %s1355_s12 = scalar_lea.vmem %s1395_s5, %s1036_s9 }
  0xb0   : > { %542 = vrot.lane.b32.xlu1 %v501_v30, %s1179_s13  ;;  %533 = vrot.lane.b32.xlu0 %v489_v31, %s1180_s14  ;;  %s1037_s13 = sshll.u32 %s1411_s24, 1  ;;  %s1038_s14 = sshll.u32 %s1409_s25, 2 }
  0xb4   : > { %494 = vrot.lane.b32.xlu1 %v489_v31, %s1181_s15  ;;  %482 = vrot.lane.b32.xlu0 %v477_v29, %s1182_s16  ;;  %v1131_v29 = vld [vmem:[%s1393_s3] sm:$0xff]   ;;  %v721_v31 = vsub.s32 2, %v1262_v4  ;;  %s410_s15 = sadd.s32 %s1038_s14, %s1037_s13 }
  0xb5   : > { %s1039_s16 = sshll.u32 %s410_s15, 3 }
  0xb6   : > { %s412_s19 = scalar_lea.vmem %s1396_s6, %s1039_s16  ;;  %s421_s22 = scalar_lea.vmem %s1397_s7, %s1039_s16 }
  0xb8   : > { %502 = vrot.lane.b32.xlu1 %v499_v21, %s1183_s17  ;;  %506 = vrot.lane.b32.xlu0 %v501_v30, %s1183_s17 }
  0xfe   : > { %v512_v33 = vpop.permute.xlu1 %511  ;;  %v548_v34 = vpop.permute.xlu0 %547 }
 0x102   : > { %v550_v35 = vpop.permute.xlu1 %549  ;;  %v521_v36 = vpop.permute.xlu0 %520 }
 0x103   : > { %v554_v41 = vsel %vm553_vm4, %v548_v34, %v550_v35  ;;  %v722_v34 = vrot.slane %v709_v32, %v721_v31 }
 0x104   : > { %v617_v46 = vsel %vm556_vm5, %v554_v41, 0 }
 0x106   : > { %v514_v37 = vpop.permute.xlu1 %513  ;;  %v539_v38 = vpop.permute.xlu0 %538 }
 0x107   : > { %v518_v57 = vsel %vm517_vm8, %v512_v33, %v514_v37  ;;  %v713_v33 = vsub.s32 0, %v1262_v4 }
 0x10a   : > { %v530_v39 = vpop.permute.xlu1 %529  ;;  %v491_v40 = vpop.permute.xlu0 %490 }
 0x10e   : > { %v479_v42 = vpop.permute.xlu1 %478  ;;  %v552_v43 = vpop.permute.xlu0 %551 }
 0x10f   : > { %v555_v44 = vsel %vm553_vm4, %v550_v35, %v552_v43  ;;  %v623_v45 = vsel %vm556_vm5, %v552_v43, 0  ;;  %v717_v35 = vsub.s32 1, %v1262_v4 }
 0x110   : > { %1045 = vmatprep.subr.msk.bf16.mxu0 %vm556_vm5, %v555_v44  ;;  %1063 = vmatpush3.bf16.msra.mxu1 %v623_v45 }
 0x111   : > { %636 = vmatpush1.bf16.msra.mxu0 %v617_v46  ;;  %1064 = vmatprep.subr.bf16.mxu1 %v1177_v19 }
 0x112   : > { %v523_v47 = vpop.permute.xlu1 %522  ;;  %v516_v48 = vpop.permute.xlu0 %515 }
 0x113   : > { %v527_v53 = vsel %vm526_vm6, %v521_v36, %v523_v47  ;;  %v519_v60 = vsel %vm517_vm8, %v514_v37, %v516_v48  ;;  %v714_v37 = vrot.slane %v709_v32, %v713_v33 }
 0x114   : > { %v583_v59 = vsel %vm556_vm5, %v518_v57, %v527_v53 }
 0x116   : > { %v532_v49 = vpop.permute.xlu1 %531  ;;  %v541_v50 = vpop.permute.xlu0 %540 }
 0x117   : > { %v536_v56 = vsel %vm535_vm7, %v530_v39, %v532_v49  ;;  %v545_v61 = vsel %vm544_vm9, %v539_v38, %v541_v50  ;;  %v718_v39 = vrot.slane %v709_v32, %v717_v35 }
 0x118   : > { %v591_v1 = vsel %vm564_vm10, %v583_v59, %v536_v56 }
 0x119   : > { %v597_v13 = vsel %vm571_vm12, %v591_v1, %v545_v61 }
 0x11a   : > { %v481_v51 = vpop.permute.xlu1 %480  ;;  %v493_v52 = vpop.permute.xlu0 %492 }
 0x11b   : > { %v485_v7 = vsel %vm484_vm11, %v479_v42, %v481_v51  ;;  %v497_v16 = vsel %vm496_vm13, %v491_v40, %v493_v52 }
 0x11c   : > { %v558_v14 = vsel %vm556_vm5, %v1277_v15, %v485_v7 }
 0x11d   : > { %v566_v15 = vsel %vm564_vm10, %v558_v14, %v497_v16 }
 0x11e   : > { %v505_v54 = vpop.permute.xlu1 %504  ;;  %v525_v55 = vpop.permute.xlu0 %524 }
 0x11f   : > { %v528_v58 = vsel %vm526_vm6, %v523_v47, %v525_v55  ;;  %v589_v62 = vsel %vm556_vm5, %v516_v48, %v525_v55 }
 0x120   : > { %v586_v2 = vsel %vm556_vm5, %v519_v60, %v528_v58 }
 0x122   : > { %v543_v63 = vpop.permute.xlu1 %542  ;;  %v534_v0 = vpop.permute.xlu0 %533 }
 0x123   : > { %v546_v3 = vsel %vm544_vm9, %v541_v50, %v543_v63  ;;  %v537_v5 = vsel %vm535_vm7, %v532_v49, %v534_v0  ;;  %v595_v6 = vsel %vm564_vm10, %v589_v62, %v534_v0 }
 0x124   : > { %v603_v8 = vsel %vm571_vm12, %v595_v6, %v543_v63  ;;  %v593_v9 = vsel %vm564_vm10, %v586_v2, %v537_v5 }
 0x125   : > { %1065 = vmatpush3.bf16.msra.mxu1 %v603_v8  ;;  %v600_v10 = vsel %vm571_vm12, %v593_v9, %v546_v3 }
 0x126   : > { %v495_v11 = vpop.permute.xlu1 %494  ;;  %637 = vmatprep.subr.bf16.mxu0 %v600_v10  ;;  %v483_v12 = vpop.permute.xlu0 %482  ;;  %1066 = vmatprep.subr.bf16.mxu1 %v1177_v19 }
 0x127   : > { %v486_v17 = vsel %vm484_vm11, %v481_v51, %v483_v12  ;;  %v563_v20 = vsel %vm556_vm5, %v1295_v25, %v483_v12  ;;  %638 = vmatpush1.bf16.msra.mxu0 %v597_v13  ;;  %v498_v21 = vsel %vm496_vm13, %v493_v52, %v495_v11 }
 0x128   : > { %v561_v22 = vsel %vm556_vm5, %v1284_v18, %v486_v17  ;;  %v570_v19 = vsel %vm564_vm10, %v563_v20, %v495_v11 }
 0x129   : > { %v568_v25 = vsel %vm564_vm10, %v561_v22, %v498_v21 }
 0x12a   : > { %v503_v23 = vpop.permute.xlu1 %502  ;;  %v507_v24 = vpop.permute.xlu0 %506 }
 0x12b   : > { %v509_v26 = vsel %vm508_vm14, %v503_v23, %v505_v54  ;;  %v510_v27 = vsel %vm508_vm14, %v505_v54, %v507_v24  ;;  %v579_v28 = vsel %vm571_vm12, %v570_v19, %v507_v24 }
 0x12c   : > { %1067 = vmatpush3.bf16.msra.mxu1 %v579_v28  ;;  %v576_v18 = vsel %vm571_vm12, %v568_v25, %v510_v27  ;;  %v573_v30 = vsel %vm571_vm12, %v566_v15, %v509_v26 }
 0x12d   : > { %639 = vmatprep.subr.bf16.mxu0 %v576_v18 }
 0x12e   : > { %640 = vmatpush1.bf16.msra.mxu0 %v573_v30 }
 0x12f   : > { %1069 = vmatmul.mubr.msk.bf16.vlgmr.msra.gmra.mxu1 %vm612_vm15, %v1131_v29 }
 0x131   : > { %1046 = vmatmul.mubr.msk.bf16.vlgmr.msra.gmra.mxu0 %vm612_vm15, %v1131_v29 }
 0x1ef   : > { %v702_v36 = vpop.f32.mrf.mxu1 }
 0x1f0   : > { %v728_v38 = vmul.f32 %v722_v34, %v702_v36 }
 0x1f1   : > { %v659_v40 = vpop.f32.mrf.mxu0  ;;  %v1070_v41 = vpop.f32.mrf.mxu1 }
 0x1f2   : > { %v1055_v42 = vpack.c.bf16 %v728_v38, %v728_v38  ;;  %v726_v43 = vmul.f32 %v714_v37, %v659_v40  ;;  %v734_v49 = vsel %vm733_vm1, %v728_v38, 0.0  ;;  %v748_v53 = vmul.f32 %v728_v38, %v728_v38 }
 0x1f3   : > { %v661_v44 = vpop.f32.mrf.mxu0  ;;  %v705_v4 = vpop.f32.mrf.mxu1 }
 0x1f4   : > { %786 = vst.msk [vmem:[%s1355_s12 + $0x8] sm:$0xf] %vm785_vm0, %v1055_v42  ;;  %v727_v45 = vmul.f32 %v718_v39, %v661_v44  ;;  %v731_v46 = vmul.f32 %v722_v34, %v705_v4  ;;  %v746_v54 = vmul.f32 %v726_v43, %v726_v43  ;;  %v753_v63 = vsel %vm733_vm1, %v748_v53, 0.0 }
 0x1f5   : > { %v663_v47 = vpop.f32.mrf.mxu0  ;;  %v1071_v48 = vpop.f32.mrf.mxu1 }
 0x1f6   : > { %v747_v50 = vmul.f32 %v727_v45, %v727_v45  ;;  %v1054_v51 = vpack.c.bf16 %v727_v45, %v726_v43  ;;  %v1057_v52 = vpack.c.bf16 %v731_v46, %v731_v46  ;;  %v729_v55 = vmul.f32 %v714_v37, %v663_v47 }
 0x1f7   : > { %v665_v56 = vpop.f32.mrf.mxu0  ;;  %v732_v57 = vadd.f32 %v727_v45, %v726_v43  ;;  %v739_v2 = vsel %vm733_vm1, %v731_v46, 0.0  ;;  %v751_v5 = vmul.f32 %v731_v46, %v731_v46 }
 0x1f8   : > { %784 = vst [vmem:[%s1355_s12] sm:$0xff] %v1054_v51  ;;  %788 = vst.msk [vmem:[%s1355_s12 + $0x14] sm:$0xf] %vm785_vm0, %v1057_v52  ;;  %v730_v58 = vmul.f32 %v718_v39, %v665_v56  ;;  %v752_v60 = vadd.f32 %v747_v50, %v746_v54  ;;  %v749_v1 = vmul.f32 %v729_v55, %v729_v55 }
 0x1f9   : > { %v735_v59 = vadd.f32 %v734_v49, %v732_v57  ;;  %v758_v8 = vsel %vm733_vm1, %v751_v5, 0.0 }
 0x1fa   : > { %v750_v61 = vmul.f32 %v730_v58, %v730_v58  ;;  %v1056_v62 = vpack.c.bf16 %v730_v58, %v729_v55  ;;  %v738_v0 = vadd.f32 %v730_v58, %v729_v55  ;;  %v754_v6 = vadd.f32 %v753_v63, %v752_v60 }
 0x1fb   : > { %736 = vadd.xlane.f32.xlu0 %v735_v59 }
 0x1fc   : > { %787 = vst [vmem:[%s1355_s12 + $0xc] sm:$0xff] %v1056_v62  ;;  %v740_v3 = vadd.f32 %v739_v2, %v738_v0  ;;  %v757_v7 = vadd.f32 %v750_v61, %v749_v1 }
 0x1fe   : > { %741 = vadd.xlane.f32.xlu1 %v740_v3  ;;  %v759_v9 = vadd.f32 %v758_v8, %v757_v7 }
 0x1ff   : > { %755 = vadd.xlane.f32.xlu0 %v754_v6 }
 0x203   : > { %760 = vadd.xlane.f32.xlu0 %v759_v9 }
 0x284   : > { %v737_v10 = vpop.xlane.xlu0 %736 }
 0x285   : > { %744 = vst.msk [vmem:[%s412_s19] sm:$0xff] %vm743_vm2, %v737_v10 }
 0x287   : > { %v742_v11 = vpop.xlane.xlu1 %741 }
 0x288   : > { %v756_v12 = vpop.xlane.xlu0 %755  ;;  %745 = vst.msk [vmem:[%s412_s19 + $0x8] sm:$0xff] %vm743_vm2, %v742_v11 }
 0x289   : > { %762 = vst.msk [vmem:[%s421_s22] sm:$0xff] %vm743_vm2, %v756_v12 }
 0x28c   : > { %v761_v13 = vpop.xlane.xlu0 %760 }
 0x28d   : > { %763 = vst.msk [vmem:[%s421_s22 + $0x8] sm:$0xff] %vm743_vm2, %v761_v13 }
 0x28e PF: > { %s18_s28 = sadd.s32 1, %s1170_s28   ;;  %s1398_s24 = smov %s1162_s26 }
 0x28f   : > { %p15_p7 = scmp.ge.s32.totalorder %s18_s28, 6   ;;  %s1399_s25 = smov %s1166_s27 }
 0x290   : > { %s1400_s26 = smov %s1403_s29  ;;  %s1401_s27 = smov %s1407_s30 }
 0x291   :  { %17 = sbr.rel (!%p15_p7) target bundleno = 3 (0x3), region = 100 }

</bundles_post_ra>
